<compile_context>
chip_gen: v6e
topology: v6e:2x2x1
jax: 0.10.0
libtpu: 0.0.40
codegen_flags: <defaults>
</compile_context>

<pallas_src>
import jax
import jax.numpy as jnp
from jax.experimental import pallas as pl
from jax.experimental.pallas import tpu as pltpu

IN_DIM = 784
HID = 256
N_CLASSES = 10
PAD_CLASSES = 128          # lane-dense output width
NEG_BIG = -1e30            # padded-logit bias -> exp underflows to exactly 0
MAX_TB = 1024              # keeps double-buffered VMEM ~8 MiB (v5e-safe)


def _leaky_relu(x, alpha=0.2):
    # maximum(x, 0.2*x) == LeakyReLU(0.2) for alpha < 1
    return jnp.maximum(x, alpha * x)


def discriminator_kernel(x_ref, w1_ref, b1_ref, w2_ref, b2_ref,
                         w3_ref, b3_ref, o_ref):
    # x: (TB, 784) f32 (cast to bf16 in-register); weights bf16; biases f32;
    # output (TB, 128) bf16.
    x = x_ref[...].astype(jnp.bfloat16)

    # Linear(784 -> 256) + LeakyReLU(0.2)   (bf16 MXU, f32 accumulate)
    h1 = jnp.dot(x, w1_ref[...], preferred_element_type=jnp.float32)
    h1 = _leaky_relu(h1 + b1_ref[...])

    # Linear(256 -> 256) + LeakyReLU(0.2)
    h2 = jnp.dot(h1.astype(jnp.bfloat16), w2_ref[...],
                 preferred_element_type=jnp.float32)
    h2 = _leaky_relu(h2 + b2_ref[...])

    # Linear(256 -> 128-padded); padded columns carry a huge negative bias.
    logits = jnp.dot(h2.astype(jnp.bfloat16), w3_ref[...],
                     preferred_element_type=jnp.float32) + b3_ref[...]

    # Numerically stable softmax over 128 lanes (padded lanes -> exp == 0).
    m = jnp.max(logits, axis=-1, keepdims=True)
    e = jnp.exp(logits - m)
    denom = jnp.sum(e, axis=-1, keepdims=True)
    o_ref[...] = (e * pl.reciprocal(denom, approx=True)).astype(o_ref.dtype)


def _round_up(n, m):
    return ((n + m - 1) // m) * m


def _choose_tiling(B, max_tb=MAX_TB):
    """Pick (padded batch, batch tile). Minimal padding for small batches,
    >=2 tiles when b_pad >= 512 (both v7x TCs), tile capped at max_tb."""
    b_pad = _round_up(B, 16)
    if b_pad <= max_tb:
        if b_pad >= 512 and b_pad % 32 == 0:
            tb = b_pad // 2
        else:
            tb = b_pad
    else:
        tb = max_tb
        b_pad = _round_up(B, tb)
    return b_pad, tb


@jax.jit
def discriminator_forward(x, params):
    """x: (B, 784) float; params: dict of (in, out)-layout weights + biases."""
    B = x.shape[0]
    b_pad, tb = _choose_tiling(B)
    n_tiles = b_pad // tb

    # Keep x in f32; the bf16 cast happens inside the kernel (no extra HBM pass).
    x_in = x.astype(jnp.float32)
    if b_pad != B:
        x_in = jnp.pad(x_in, ((0, b_pad - B), (0, 0)))

    w1 = params["w1"].astype(jnp.bfloat16)
    w2 = params["w2"].astype(jnp.bfloat16)
    b1 = params["b1"].astype(jnp.float32)
    b2 = params["b2"].astype(jnp.float32)

    # Pad the 10-wide classifier to 128 lanes; padded bias -> -inf-like.
    w3p = jnp.pad(params["w3"],
                  ((0, 0), (0, PAD_CLASSES - N_CLASSES))).astype(jnp.bfloat16)
    b3p = jnp.pad(params["b3"].astype(jnp.float32),
                  ((0, 0), (0, PAD_CLASSES - N_CLASSES)),
                  constant_values=NEG_BIG)

    cost = pl.CostEstimate(
        flops=2 * b_pad * (IN_DIM * HID + HID * HID + HID * PAD_CLASSES),
        transcendentals=b_pad * PAD_CLASSES,
        bytes_accessed=(b_pad * IN_DIM * 4                       # x (f32)
                        + (IN_DIM * HID + HID * HID + HID * PAD_CLASSES) * 2
                        + (HID + HID + PAD_CLASSES) * 4
                        + b_pad * PAD_CLASSES * 2),              # out (bf16)
    )

    out = pl.pallas_call(
        discriminator_kernel,
        out_shape=jax.ShapeDtypeStruct((b_pad, PAD_CLASSES), jnp.bfloat16),
        grid_spec=pltpu.PrefetchScalarGridSpec(
            num_scalar_prefetch=0,
            grid=(n_tiles,),
            in_specs=[
                pl.BlockSpec((tb, IN_DIM), lambda i: (i, 0)),            # x
                pl.BlockSpec((IN_DIM, HID), lambda i: (0, 0)),           # w1
                pl.BlockSpec((1, HID), lambda i: (0, 0)),                # b1
                pl.BlockSpec((HID, HID), lambda i: (0, 0)),              # w2
                pl.BlockSpec((1, HID), lambda i: (0, 0)),                # b2
                pl.BlockSpec((HID, PAD_CLASSES), lambda i: (0, 0)),      # w3p
                pl.BlockSpec((1, PAD_CLASSES), lambda i: (0, 0)),        # b3p
            ],
            out_specs=pl.BlockSpec((tb, PAD_CLASSES), lambda i: (i, 0)),
        ),
        compiler_params=pltpu.CompilerParams(
            dimension_semantics=("parallel",),   # shards batch tiles on v7x
        ),
        cost_estimate=cost,
    )(x_in, w1, b1, w2, b2, w3p, b3p)

    # Drop padded rows / padded class columns; return f32 like the PyTorch ref.
    return out[:B, :N_CLASSES].astype(jnp.float32)


def init_params(key):
    """Deterministic synthetic init matching nn.Linear shapes (transposed)."""
    ks = jax.random.split(key, 6)

    def uniform(k, shape, fan_in):
        bound = 1.0 / jnp.sqrt(fan_in)
        return jax.random.uniform(k, shape, jnp.float32, -bound, bound)

    return {
        # stored as (in, out); biases kept 2D (1, out) for TPU-friendly layout
        "w1": uniform(ks[0], (IN_DIM, HID), float(IN_DIM)),
        "b1": uniform(ks[1], (1, HID), float(IN_DIM)),
        "w2": uniform(ks[2], (HID, HID), float(HID)),
        "b2": uniform(ks[3], (1, HID), float(HID)),
        "w3": uniform(ks[4], (HID, N_CLASSES), float(HID)),
        "b3": uniform(ks[5], (1, N_CLASSES), float(HID)),
    }


def reference_forward(x, params):
    """Pure-JAX reference using the same bf16-operand / f32-accumulate math."""
    xb = x.astype(jnp.bfloat16)
    w1 = params["w1"].astype(jnp.bfloat16)
    w2 = params["w2"].astype(jnp.bfloat16)
    w3 = params["w3"].astype(jnp.bfloat16)
    h1 = _leaky_relu(jnp.dot(xb, w1, preferred_element_type=jnp.float32)
                     + params["b1"])
    h2 = _leaky_relu(jnp.dot(h1.astype(jnp.bfloat16), w2,
                             preferred_element_type=jnp.float32)
                     + params["b2"])
    logits = (jnp.dot(h2.astype(jnp.bfloat16), w3,
                      preferred_element_type=jnp.float32) + params["b3"])
    return jax.nn.softmax(logits, axis=-1)


if __name__ == "__main__":
    key = jax.random.PRNGKey(0)
    k_params, k_x = jax.random.split(key)
    params = init_params(k_params)

    B = 8  # small self-test batch; real workloads should use >=256 rows
    x = jax.random.normal(k_x, (B, IN_DIM), jnp.float32)

    out = jax.block_until_ready(discriminator_forward(x, params))
    ref = reference_forward(x, params)

    assert out.shape == (B, N_CLASSES)
    assert out.dtype == jnp.float32
    max_err = jnp.max(jnp.abs(out - ref))
    # bf16 output quantization + approx reciprocal -> ~1e-2 tolerance
    assert jnp.allclose(out, ref, atol=2e-2, rtol=2e-2), \
        f"max abs err {max_err}"
    assert jnp.allclose(jnp.sum(out, axis=-1), jnp.ones((B,)), atol=2e-2)

    print("KERNEL_OK")
</pallas_src>

<mosaic_0001>
module attributes {stable_mosaic.version = 11 : i64} {
  func.func @discriminator_kernel(%arg0: i32, %arg1: memref<16x784xf32, #tpu.memory_space<vmem>>, %arg2: memref<784x256xbf16, #tpu.memory_space<vmem>>, %arg3: memref<1x256xf32, #tpu.memory_space<vmem>>, %arg4: memref<256x256xbf16, #tpu.memory_space<vmem>>, %arg5: memref<1x256xf32, #tpu.memory_space<vmem>>, %arg6: memref<256x128xbf16, #tpu.memory_space<vmem>>, %arg7: memref<1x128xf32, #tpu.memory_space<vmem>>, %arg8: memref<16x128xbf16, #tpu.memory_space<vmem>>) attributes {dimension_semantics = [#tpu.dimension_semantics<parallel>], iteration_bounds = array<i64: 1>, scalar_prefetch = 0 : i64, scratch_operands = 0 : i64, tpu.core_type = #tpu.core_type<tc>, window_params = [{transform_indices = @transform_0, window_bounds = array<i64: 16, 784>}, {pipeline_mode = #tpu.pipeline_mode<synchronous>, transform_indices = @transform_1, window_bounds = array<i64: 784, 256>}, {pipeline_mode = #tpu.pipeline_mode<synchronous>, transform_indices = @transform_2, window_bounds = array<i64: 1, 256>}, {pipeline_mode = #tpu.pipeline_mode<synchronous>, transform_indices = @transform_3, window_bounds = array<i64: 256, 256>}, {pipeline_mode = #tpu.pipeline_mode<synchronous>, transform_indices = @transform_4, window_bounds = array<i64: 1, 256>}, {pipeline_mode = #tpu.pipeline_mode<synchronous>, transform_indices = @transform_5, window_bounds = array<i64: 256, 128>}, {pipeline_mode = #tpu.pipeline_mode<synchronous>, transform_indices = @transform_6, window_bounds = array<i64: 1, 128>}, {transform_indices = @transform_7, window_bounds = array<i64: 16, 128>}]} {
    %c0 = arith.constant 0 : index
    %c0_0 = arith.constant 0 : index
    %0 = vector.load %arg1[%c0, %c0_0] : memref<16x784xf32, #tpu.memory_space<vmem>>, vector<16x784xf32>
    %1 = arith.truncf %0 : vector<16x784xf32> to vector<16x784xbf16>
    %c0_1 = arith.constant 0 : index
    %c0_2 = arith.constant 0 : index
    %2 = vector.load %arg2[%c0_1, %c0_2] : memref<784x256xbf16, #tpu.memory_space<vmem>>, vector<784x256xbf16>
    %cst = arith.constant dense<0.000000e+00> : vector<16x256xf32>
    %3 = tpu.matmul %1, %2, %cst {dimension_numbers = #tpu.dot_dimension_numbers<[1], [0], [0], [1], [0, 0, 1, 1], [], []>} : vector<16x784xbf16>, vector<784x256xbf16>, vector<16x256xf32> -> vector<16x256xf32>
    %c0_3 = arith.constant 0 : index
    %c0_4 = arith.constant 0 : index
    %4 = vector.load %arg3[%c0_3, %c0_4] : memref<1x256xf32, #tpu.memory_space<vmem>>, vector<1x256xf32>
    %5 = vector.broadcast %4 : vector<1x256xf32> to vector<16x256xf32>
    %6 = arith.addf %3, %5 : vector<16x256xf32>
    %cst_5 = arith.constant 2.000000e-01 : f32
    %7 = vector.broadcast %cst_5 : f32 to vector<16x256xf32>
    %8 = arith.mulf %7, %6 : vector<16x256xf32>
    %9 = arith.maximumf %6, %8 : vector<16x256xf32>
    %10 = arith.truncf %9 : vector<16x256xf32> to vector<16x256xbf16>
    %c0_6 = arith.constant 0 : index
    %c0_7 = arith.constant 0 : index
    %11 = vector.load %arg4[%c0_6, %c0_7] : memref<256x256xbf16, #tpu.memory_space<vmem>>, vector<256x256xbf16>
    %cst_8 = arith.constant dense<0.000000e+00> : vector<16x256xf32>
    %12 = tpu.matmul %10, %11, %cst_8 {dimension_numbers = #tpu.dot_dimension_numbers<[1], [0], [0], [1], [0, 0, 1, 1], [], []>} : vector<16x256xbf16>, vector<256x256xbf16>, vector<16x256xf32> -> vector<16x256xf32>
    %c0_9 = arith.constant 0 : index
    %c0_10 = arith.constant 0 : index
    %13 = vector.load %arg5[%c0_9, %c0_10] : memref<1x256xf32, #tpu.memory_space<vmem>>, vector<1x256xf32>
    %14 = vector.broadcast %13 : vector<1x256xf32> to vector<16x256xf32>
    %15 = arith.addf %12, %14 : vector<16x256xf32>
    %cst_11 = arith.constant 2.000000e-01 : f32
    %16 = vector.broadcast %cst_11 : f32 to vector<16x256xf32>
    %17 = arith.mulf %16, %15 : vector<16x256xf32>
    %18 = arith.maximumf %15, %17 : vector<16x256xf32>
    %19 = arith.truncf %18 : vector<16x256xf32> to vector<16x256xbf16>
    %c0_12 = arith.constant 0 : index
    %c0_13 = arith.constant 0 : index
    %20 = vector.load %arg6[%c0_12, %c0_13] : memref<256x128xbf16, #tpu.memory_space<vmem>>, vector<256x128xbf16>
    %cst_14 = arith.constant dense<0.000000e+00> : vector<16x128xf32>
    %21 = tpu.matmul %19, %20, %cst_14 {dimension_numbers = #tpu.dot_dimension_numbers<[1], [0], [0], [1], [0, 0, 1, 1], [], []>} : vector<16x256xbf16>, vector<256x128xbf16>, vector<16x128xf32> -> vector<16x128xf32>
    %c0_15 = arith.constant 0 : index
    %c0_16 = arith.constant 0 : index
    %22 = vector.load %arg7[%c0_15, %c0_16] : memref<1x128xf32, #tpu.memory_space<vmem>>, vector<1x128xf32>
    %23 = vector.broadcast %22 : vector<1x128xf32> to vector<16x128xf32>
    %24 = arith.addf %21, %23 : vector<16x128xf32>
    %cst_17 = arith.constant dense<0xFF800000> : vector<16xf32>
    %25 = vector.multi_reduction <maximumf>, %24, %cst_17 [1] : vector<16x128xf32> to vector<16xf32>
    %26 = vector.shape_cast %25 : vector<16xf32> to vector<16x1xf32>
    %27 = vector.broadcast %26 : vector<16x1xf32> to vector<16x128xf32>
    %28 = arith.subf %24, %27 : vector<16x128xf32>
    %29 = math.exp %28 : vector<16x128xf32>
    %cst_18 = arith.constant dense<0.000000e+00> : vector<16xf32>
    %30 = vector.multi_reduction <add>, %29, %cst_18 [1] : vector<16x128xf32> to vector<16xf32>
    %31 = vector.shape_cast %30 : vector<16xf32> to vector<16x1xf32>
    %32 = tpu.reciprocal %31 {approx = true} : vector<16x1xf32> -> vector<16x1xf32>
    %33 = vector.broadcast %32 : vector<16x1xf32> to vector<16x128xf32>
    %34 = arith.mulf %29, %33 : vector<16x128xf32>
    %35 = arith.truncf %34 : vector<16x128xf32> to vector<16x128xbf16>
    %c0_19 = arith.constant 0 : index
    %c0_20 = arith.constant 0 : index
    %36 = vector.load %arg8[%c0_19, %c0_20] : memref<16x128xbf16, #tpu.memory_space<vmem>>, vector<16x128xbf16>
    tpu.vector_store %arg8[%c0_19, %c0_20], %35 {strides = array<i32>} : memref<16x128xbf16, #tpu.memory_space<vmem>>, vector<16x128xbf16>,
    return
  }
  func.func @transform_0(%arg0: i32) -> (i32, i32) {
    %c0_i32 = arith.constant 0 : i32
    %c0_i32_0 = arith.constant 0 : i32
    return %arg0, %c0_i32 : i32, i32
  }
  func.func @transform_1(%arg0: i32) -> (i32, i32) {
    %c0_i32 = arith.constant 0 : i32
    %c0_i32_0 = arith.constant 0 : i32
    %c0_i32_1 = arith.constant 0 : i32
    return %c0_i32, %c0_i32_0 : i32, i32
  }
  func.func @transform_2(%arg0: i32) -> (i32, i32) {
    %c0_i32 = arith.constant 0 : i32
    %c0_i32_0 = arith.constant 0 : i32
    %c0_i32_1 = arith.constant 0 : i32
    return %c0_i32, %c0_i32_0 : i32, i32
  }
  func.func @transform_3(%arg0: i32) -> (i32, i32) {
    %c0_i32 = arith.constant 0 : i32
    %c0_i32_0 = arith.constant 0 : i32
    %c0_i32_1 = arith.constant 0 : i32
    return %c0_i32, %c0_i32_0 : i32, i32
  }
  func.func @transform_4(%arg0: i32) -> (i32, i32) {
    %c0_i32 = arith.constant 0 : i32
    %c0_i32_0 = arith.constant 0 : i32
    %c0_i32_1 = arith.constant 0 : i32
    return %c0_i32, %c0_i32_0 : i32, i32
  }
  func.func @transform_5(%arg0: i32) -> (i32, i32) {
    %c0_i32 = arith.constant 0 : i32
    %c0_i32_0 = arith.constant 0 : i32
    %c0_i32_1 = arith.constant 0 : i32
    return %c0_i32, %c0_i32_0 : i32, i32
  }
  func.func @transform_6(%arg0: i32) -> (i32, i32) {
    %c0_i32 = arith.constant 0 : i32
    %c0_i32_0 = arith.constant 0 : i32
    %c0_i32_1 = arith.constant 0 : i32
    return %c0_i32, %c0_i32_0 : i32, i32
  }
  func.func @transform_7(%arg0: i32) -> (i32, i32) {
    %c0_i32 = arith.constant 0 : i32
    %c0_i32_0 = arith.constant 0 : i32
    return %arg0, %c0_i32 : i32, i32
  }
}

</mosaic_0001>

<bundles_post_ra>
// kernel: discriminator_forward.1
= control target key start
LH: loop header
LB: loop body
LE: loop exit
PB: predicated region body
PF: predicated region fallthrough
CT: control target
= control target key end

     0   :  { %vm648_vm0 = vcmask 130048   ;;  %s2239_s1 = inlined_call_operand.vmem [shape: bf16[784,256], index: 1, kind: input, shape index: {}]   ;;  %s2240_s0 = inlined_call_operand.vmem [shape: f32[16,784], index: 0, kind: input, shape index: {}]   ;;  %s2241_s3 = inlined_call_operand.vmem [shape: bf16[256,256], index: 3, kind: input, shape index: {}]   ;;  %s2242_s5 = inlined_call_operand.vmem [shape: bf16[256,128], index: 5, kind: input, shape index: {}]   ;;  %s2243_s2 = inlined_call_operand.vmem [shape: f32[1,256], index: 2, kind: input, shape index: {}]   ;;  %s2244_s4 = inlined_call_operand.vmem [shape: f32[1,256], index: 4, kind: input, shape index: {}]   ;;  %s2245_s6 = inlined_call_operand.vmem [shape: f32[1,128], index: 6, kind: input, shape index: {}]   ;;  %s2246_s7 = inlined_call_operand.vmem [shape: bf16[16,128], index: 7, kind: output, shape index: {}]  }
   0x1   :  { %v1479_v0 = vld [vmem:[%s2239_s1 + $0x74] ss:$8 sps:$4 sm:$0xff]   ;;  %v1481_v1 = vld [vmem:[%s2239_s1 + $0x70] ss:$8 sps:$4 sm:$0xff]   ;;  %v1485_v4 = vld [vmem:[%s2239_s1 + $0x64] ss:$8 sps:$4 sm:$0xff]  }
   0x2   :  { %652 = vmatprep.subr.bf16.mxu0 %v1479_v0  ;;  %v1482_v2 = vld [vmem:[%s2239_s1 + $0x174] ss:$8 sps:$4 sm:$0xff]   ;;  %v1484_v3 = vld [vmem:[%s2239_s1 + $0x170] ss:$8 sps:$4 sm:$0xff]   ;;  %v1487_v5 = vld [vmem:[%s2239_s1 + $0x60] ss:$8 sps:$4 sm:$0xff]  }
   0x3   :  { %653 = vmatpush1.bf16.msra.mxu0 %v1481_v1  ;;  %695 = vmatprep.subr.bf16.mxu1 %v1482_v2  ;;  %v1488_v6 = vld [vmem:[%s2239_s1 + $0x164] ss:$8 sps:$4 sm:$0xff]   ;;  %v1490_v7 = vld [vmem:[%s2239_s1 + $0x160] ss:$8 sps:$4 sm:$0xff]   ;;  %v1491_v8 = vld [vmem:[%s2239_s1 + $0x54] ss:$8 sps:$4 sm:$0xff]  }
   0x4   :  { %696 = vmatpush1.bf16.msra.mxu1 %v1484_v3  ;;  %654 = vmatprep.subr.bf16.mxu0 %v1485_v4  ;;  %v1493_v9 = vld [vmem:[%s2239_s1 + $0x50] ss:$8 sps:$4 sm:$0xff]   ;;  %v1494_v10 = vld [vmem:[%s2239_s1 + $0x154] ss:$8 sps:$4 sm:$0xff]   ;;  %v1497_v11 = vld [vmem:[%s2239_s1 + $0x44] ss:$8 sps:$4 sm:$0xff]  }
   0x5   :  { %697 = vmatprep.subr.bf16.mxu1 %v1488_v6  ;;  %v1496_v12 = vld [vmem:[%s2239_s1 + $0x150] ss:$8 sps:$4 sm:$0xff]   ;;  %v1500_v13 = vld [vmem:[%s2239_s1 + $0x144] ss:$8 sps:$4 sm:$0xff]   ;;  %v1499_v14 = vld [vmem:[%s2239_s1 + $0x40] ss:$8 sps:$4 sm:$0xff]  }
   0x6   :  { %v1503_v15 = vld [vmem:[%s2239_s1 + $0x34] ss:$8 sps:$4 sm:$0xff]   ;;  %v1502_v16 = vld [vmem:[%s2239_s1 + $0x140] ss:$8 sps:$4 sm:$0xff]   ;;  %v1505_v18 = vld [vmem:[%s2239_s1 + $0x30] ss:$8 sps:$4 sm:$0xff]  }
   0x7   :  { %655 = vmatpush1.bf16.msra.mxu0 %v1487_v5  ;;  %v1506_v17 = vld [vmem:[%s2239_s1 + $0x134] ss:$8 sps:$4 sm:$0xff]   ;;  %v1509_v19 = vld [vmem:[%s2239_s1 + $0x24] ss:$8 sps:$4 sm:$0xff]   ;;  %v1508_v20 = vld [vmem:[%s2239_s1 + $0x130] ss:$8 sps:$4 sm:$0xff]  }
   0x8   :  { %656 = vmatprep.subr.bf16.mxu0 %v1491_v8  ;;  %698 = vmatpush1.bf16.msra.mxu1 %v1490_v7  ;;  %v1512_v21 = vld [vmem:[%s2239_s1 + $0x124] ss:$8 sps:$4 sm:$0xff]   ;;  %v1511_v22 = vld [vmem:[%s2239_s1 + $0x20] ss:$8 sps:$4 sm:$0xff]   ;;  %v1515_v23 = vld [vmem:[%s2239_s1 + $0x14] ss:$8 sps:$4 sm:$0xff]  }
   0x9   :  { %699 = vmatprep.subr.bf16.mxu1 %v1494_v10  ;;  %v1514_v24 = vld [vmem:[%s2239_s1 + $0x120] ss:$8 sps:$4 sm:$0xff]   ;;  %v1518_v25 = vld [vmem:[%s2239_s1 + $0x114] ss:$8 sps:$4 sm:$0xff]   ;;  %v1517_v26 = vld [vmem:[%s2239_s1 + $0x10] ss:$8 sps:$4 sm:$0xff]  }
   0xa   :  { %v1521_v27 = vld [vmem:[%s2239_s1 + $0x4] ss:$8 sps:$4 sm:$0xff]   ;;  %v1520_v28 = vld [vmem:[%s2239_s1 + $0x110] ss:$8 sps:$4 sm:$0xff]   ;;  %v1523_v30 = vld [vmem:[%s2239_s1] ss:$8 sps:$4 sm:$0xff]  }
   0xb   :  { %657 = vmatpush1.bf16.msra.mxu0 %v1493_v9  ;;  %v1524_v29 = vld [vmem:[%s2239_s1 + $0x104] ss:$8 sps:$4 sm:$0xff]   ;;  %v1527_v31 = vld [vmem:[%s2239_s1 + $0xf4] ss:$8 sps:$4 sm:$0xff]   ;;  %v1526_v32 = vld [vmem:[%s2239_s1 + $0x100] ss:$8 sps:$4 sm:$0xff]  }
   0xc   :  { %658 = vmatprep.subr.bf16.mxu0 %v1497_v11  ;;  %700 = vmatpush1.bf16.msra.mxu1 %v1496_v12  ;;  %v1530_v33 = vld [vmem:[%s2239_s1 + $0x1f4] ss:$8 sps:$4 sm:$0xff]   ;;  %v1529_v34 = vld [vmem:[%s2239_s1 + $0xf0] ss:$8 sps:$4 sm:$0xff]   ;;  %v1533_v35 = vld [vmem:[%s2239_s1 + $0xe4] ss:$8 sps:$4 sm:$0xff]  }
   0xd   :  { %701 = vmatprep.subr.bf16.mxu1 %v1500_v13  ;;  %v1532_v36 = vld [vmem:[%s2239_s1 + $0x1f0] ss:$8 sps:$4 sm:$0xff]   ;;  %v1536_v37 = vld [vmem:[%s2239_s1 + $0x1e4] ss:$8 sps:$4 sm:$0xff]   ;;  %v1535_v38 = vld [vmem:[%s2239_s1 + $0xe0] ss:$8 sps:$4 sm:$0xff]  }
   0xe   :  { %v1539_v39 = vld [vmem:[%s2239_s1 + $0xd4] ss:$8 sps:$4 sm:$0xff]   ;;  %v1538_v40 = vld [vmem:[%s2239_s1 + $0x1e0] ss:$8 sps:$4 sm:$0xff]   ;;  %v1541_v42 = vld [vmem:[%s2239_s1 + $0xd0] ss:$8 sps:$4 sm:$0xff]  }
   0xf   :  { %659 = vmatpush1.bf16.msra.mxu0 %v1499_v14  ;;  %v1542_v41 = vld [vmem:[%s2239_s1 + $0x1d4] ss:$8 sps:$4 sm:$0xff]   ;;  %v1545_v43 = vld [vmem:[%s2239_s1 + $0xc4] ss:$8 sps:$4 sm:$0xff]   ;;  %v1544_v44 = vld [vmem:[%s2239_s1 + $0x1d0] ss:$8 sps:$4 sm:$0xff]  }
  0x10   :  { %660 = vmatprep.subr.bf16.mxu0 %v1503_v15  ;;  %702 = vmatpush1.bf16.msra.mxu1 %v1502_v16  ;;  %v1548_v45 = vld [vmem:[%s2239_s1 + $0x1c4] ss:$8 sps:$4 sm:$0xff]   ;;  %v1547_v48 = vld [vmem:[%s2239_s1 + $0xc0] ss:$8 sps:$4 sm:$0xff]   ;;  %v1551_v50 = vld [vmem:[%s2239_s1 + $0xb4] ss:$8 sps:$4 sm:$0xff]  }
  0x11   :  { %703 = vmatprep.subr.bf16.mxu1 %v1506_v17  ;;  %v28_v46 = vld [vmem:[%s2240_s0 + $0x8] sm:$0xff]  ;;  %v35_v47 = vld [vmem:[%s2240_s0 + $0x40] sm:$0xff]  ;;  %v30_v52 = vld [vmem:[%s2240_s0 + $0x18] sm:$0xff] }
  0x12   :  { %v42_v49 = vpack.c.bf16 %v35_v47, %v28_v46  ;;  %v1550_v51 = vld [vmem:[%s2239_s1 + $0x1c0] ss:$8 sps:$4 sm:$0xff]   ;;  %v37_v53 = vld [vmem:[%s2240_s0 + $0x50] sm:$0xff]  ;;  %v1557_v57 = vld [vmem:[%s2239_s1 + $0xa4] ss:$8 sps:$4 sm:$0xff]  }
  0x13   :  { %661 = vmatpush1.bf16.msra.mxu0 %v1505_v18  ;;  %v1554_v54 = vld [vmem:[%s2239_s1 + $0x1b4] ss:$8 sps:$4 sm:$0xff]   ;;  %v44_v55 = vpack.c.bf16 %v37_v53, %v30_v52  ;;  %v1553_v56 = vld [vmem:[%s2239_s1 + $0xb0] ss:$8 sps:$4 sm:$0xff]   ;;  %v1560_v59 = vld [vmem:[%s2239_s1 + $0x1a4] ss:$8 sps:$4 sm:$0xff]  }
  0x14   :  { %662 = vmatprep.subr.bf16.mxu0 %v1509_v19  ;;  %704 = vmatpush1.bf16.msra.mxu1 %v1508_v20  ;;  %v1556_v58 = vld [vmem:[%s2239_s1 + $0x1b0] ss:$8 sps:$4 sm:$0xff]   ;;  %v1559_v60 = vld [vmem:[%s2239_s1 + $0xa0] ss:$8 sps:$4 sm:$0xff]   ;;  %v1563_v61 = vld [vmem:[%s2239_s1 + $0x94] ss:$8 sps:$4 sm:$0xff]  }
  0x15   :  { %705 = vmatprep.subr.bf16.mxu1 %v1512_v21  ;;  %684 = vmatprep.mubr.bf16.mxu0 %v42_v49  ;;  %v1562_v62 = vld [vmem:[%s2239_s1 + $0x1a0] ss:$8 sps:$4 sm:$0xff]   ;;  %v1566_v63 = vld [vmem:[%s2239_s1 + $0x194] ss:$8 sps:$4 sm:$0xff]   ;;  %v1565_v0 = vld [vmem:[%s2239_s1 + $0x90] ss:$8 sps:$4 sm:$0xff]  }
  0x16   :  { %727 = vmatprep.mubr.bf16.mxu1 %v44_v55  ;;  %v1568_v1 = vld [vmem:[%s2239_s1 + $0x190] ss:$8 sps:$4 sm:$0xff]   ;;  %v1569_v2 = vld [vmem:[%s2239_s1 + $0x84] ss:$8 sps:$4 sm:$0xff]   ;;  %v1571_v3 = vld [vmem:[%s2239_s1 + $0x80] ss:$8 sps:$4 sm:$0xff]  }
  0x17   :  { %663 = vmatpush1.bf16.msra.mxu0 %v1511_v22  ;;  %v1572_v4 = vld [vmem:[%s2239_s1 + $0x184] ss:$8 sps:$4 sm:$0xff]   ;;  %v1574_v6 = vld [vmem:[%s2239_s1 + $0x180] ss:$8 sps:$4 sm:$0xff]   ;;  %v34_v7 = vld [vmem:[%s2240_s0 + $0x38] sm:$0xff]  ;;  %v1698_v20 = vmov 0  }
  0x18   :  { %664 = vmatprep.subr.bf16.mxu0 %v1515_v23  ;;  %706 = vmatpush1.bf16.msra.mxu1 %v1514_v24  ;;  %v27_v5 = vld [vmem:[%s2240_s0] sm:$0xff]  ;;  %v1577_v8 = vld [vmem:[%s2239_s1 + $0x274] ss:$8 sps:$4 sm:$0xff]   ;;  %v36_v10 = vld [vmem:[%s2240_s0 + $0x48] sm:$0xff] }
  0x19   :  { %707 = vmatprep.subr.bf16.mxu1 %v1518_v25  ;;  %v29_v9 = vld [vmem:[%s2240_s0 + $0x10] sm:$0xff]  ;;  %v41_v11 = vpack.c.bf16 %v34_v7, %v27_v5  ;;  %v1580_v14 = vld [vmem:[%s2239_s1 + $0x264] ss:$8 sps:$4 sm:$0xff]   ;;  %v1620_v15 = vld [vmem:[%s2239_s1 + $0x300] ss:$8 sps:$4 sm:$0xff]  }
  0x1a   :  { %v1575_v12 = vld [vmem:[%s2239_s1 + $0x270] ss:$8 sps:$4 sm:$0xff]   ;;  %v43_v13 = vpack.c.bf16 %v36_v10, %v29_v9  ;;  %v1622_v16 = vld [vmem:[%s2239_s1 + $0x304] ss:$8 sps:$4 sm:$0xff]   ;;  %v1578_v17 = vld [vmem:[%s2239_s1 + $0x260] ss:$8 sps:$4 sm:$0xff]  }
  0x1b   :  { %665 = vmatpush1.bf16.msra.mxu0 %v1517_v26  ;;  %v1583_v18 = vld [vmem:[%s2239_s1 + $0x254] ss:$8 sps:$4 sm:$0xff]   ;;  %v32_v19 = vld [vmem:[%s2240_s0 + $0x28] sm:$0xff]  ;;  %v39_v23 = vld [vmem:[%s2240_s0 + $0x60] sm:$0xff] }
  0x1c   :  { %666 = vmatprep.subr.bf16.mxu0 %v1521_v27  ;;  %708 = vmatpush1.bf16.msra.mxu1 %v1520_v28  ;;  %v33_v21 = vld [vmem:[%s2240_s0 + $0x30] sm:$0xff]  ;;  %v40_v22 = vld [vmem:[%s2240_s0 + $0x68] sm:$0xff]  ;;  %v46_v24 = vpack.c.bf16 %v39_v23, %v32_v19  ;;  %v31_v53 = vld [vmem:[%s2240_s0 + $0x20] sm:$0xff] }
  0x1d   :  { %709 = vmatprep.subr.bf16.mxu1 %v1524_v29  ;;  %v1581_v25 = vld [vmem:[%s2239_s1 + $0x250] ss:$8 sps:$4 sm:$0xff]   ;;  %v1586_v26 = vld [vmem:[%s2239_s1 + $0x244] ss:$8 sps:$4 sm:$0xff]   ;;  %v47_v27 = vpack.c.bf16 %v40_v22, %v33_v21  ;;  %v1584_v28 = vld [vmem:[%s2239_s1 + $0x240] ss:$8 sps:$4 sm:$0xff]  }
  0x1e   :  { %v1589_v29 = vld [vmem:[%s2239_s1 + $0x234] ss:$8 sps:$4 sm:$0xff]   ;;  %v1611_v46 = vld [vmem:[%s2239_s1 + $0x2b0] ss:$8 sps:$4 sm:$0xff]   ;;  %v1616_v47 = vld [vmem:[%s2239_s1 + $0x2a4] ss:$8 sps:$4 sm:$0xff]  }
  0x1f   :  { %667 = vmatpush1.bf16.msra.mxu0 %v1523_v30  ;;  %v1587_v30 = vld [vmem:[%s2239_s1 + $0x230] ss:$8 sps:$4 sm:$0xff]   ;;  %v1619_v49 = vld [vmem:[%s2239_s1 + $0x294] ss:$8 sps:$4 sm:$0xff]   ;;  %v1623_v52 = vld [vmem:[%s2239_s1 + $0x280] ss:$8 sps:$4 sm:$0xff]  }
  0x20   :  { %668 = vmatprep.subr.bf16.mxu0 %v1527_v31  ;;  %710 = vmatpush1.bf16.msra.mxu1 %v1526_v32  ;;  %v1592_v31 = vld [vmem:[%s2239_s1 + $0x224] ss:$8 sps:$4 sm:$0xff]   ;;  %v1590_v32 = vld [vmem:[%s2239_s1 + $0x220] ss:$8 sps:$4 sm:$0xff]   ;;  %v1644_v5 = vld [vmem:[%s2241_s3 + $0x10] ss:$8 sps:$4 sm:$0xff]  }
  0x21   :  { %711 = vmatprep.subr.bf16.mxu1 %v1530_v33  ;;  %v1595_v33 = vld [vmem:[%s2239_s1 + $0x214] ss:$8 sps:$4 sm:$0xff]   ;;  %v1647_v7 = vld [vmem:[%s2241_s3] ss:$8 sps:$4 sm:$0xff]   ;;  %v1650_v9 = vld [vmem:[%s2241_s3 + $0xf0] ss:$8 sps:$4 sm:$0xff]  }
  0x22   :  { %v1655_v10 = vld [vmem:[%s2241_s3 + $0xe4] ss:$8 sps:$4 sm:$0xff]   ;;  %v1665_v19 = vld [vmem:[%s2241_s3 + $0xa0] ss:$8 sps:$4 sm:$0xff]   ;;  %v1668_v21 = vld [vmem:[%s2241_s3 + $0x90] ss:$8 sps:$4 sm:$0xff]  }
  0x23   :  { %669 = vmatpush2.bf16.msra.mxu0 %v1529_v34  ;;  %v1593_v34 = vld [vmem:[%s2239_s1 + $0x210] ss:$8 sps:$4 sm:$0xff]   ;;  %v1673_v22 = vld [vmem:[%s2241_s3 + $0x84] ss:$8 sps:$4 sm:$0xff]   ;;  %v1671_v23 = vld [vmem:[%s2241_s3 + $0x80] ss:$8 sps:$4 sm:$0xff]  }
  0x24   :  { %670 = vmatprep.subr.bf16.mxu0 %v1533_v35  ;;  %712 = vmatpush2.bf16.msra.mxu1 %v1532_v36  ;;  %v1598_v35 = vld [vmem:[%s2239_s1 + $0x204] ss:$8 sps:$4 sm:$0xff]   ;;  %v1596_v36 = vld [vmem:[%s2239_s1 + $0x200] ss:$8 sps:$4 sm:$0xff]  }
  0x25   :  { %713 = vmatprep.subr.bf16.mxu1 %v1536_v37  ;;  %v1601_v37 = vld [vmem:[%s2239_s1 + $0x2f4] ss:$8 sps:$4 sm:$0xff]  }
  0x27   :  { %671 = vmatpush2.bf16.msra.mxu0 %v1535_v38  ;;  %v1599_v38 = vld [vmem:[%s2239_s1 + $0x2f0] ss:$8 sps:$4 sm:$0xff]  }
  0x28   :  { %672 = vmatprep.subr.bf16.mxu0 %v1539_v39  ;;  %714 = vmatpush2.bf16.msra.mxu1 %v1538_v40  ;;  %v1604_v39 = vld [vmem:[%s2239_s1 + $0x2e4] ss:$8 sps:$4 sm:$0xff]   ;;  %v1602_v40 = vld [vmem:[%s2239_s1 + $0x2e0] ss:$8 sps:$4 sm:$0xff]  }
  0x29   :  { %715 = vmatprep.subr.bf16.mxu1 %v1542_v41  ;;  %v1607_v41 = vld [vmem:[%s2239_s1 + $0x2d4] ss:$8 sps:$4 sm:$0xff]  }
  0x2b   :  { %673 = vmatpush2.bf16.msra.mxu0 %v1541_v42  ;;  %v1605_v42 = vld [vmem:[%s2239_s1 + $0x2d0] ss:$8 sps:$4 sm:$0xff]  }
  0x2c   :  { %674 = vmatprep.subr.bf16.mxu0 %v1545_v43  ;;  %716 = vmatpush2.bf16.msra.mxu1 %v1544_v44  ;;  %v1610_v43 = vld [vmem:[%s2239_s1 + $0x2c4] ss:$8 sps:$4 sm:$0xff]   ;;  %v1608_v44 = vld [vmem:[%s2239_s1 + $0x2c0] ss:$8 sps:$4 sm:$0xff]  }
  0x2d   :  { %717 = vmatprep.subr.bf16.mxu1 %v1548_v45  ;;  %v1613_v45 = vld [vmem:[%s2239_s1 + $0x2b4] ss:$8 sps:$4 sm:$0xff]  }
  0x2f   :  { %675 = vmatpush2.bf16.msra.mxu0 %v1547_v48  ;;  %v1614_v48 = vld [vmem:[%s2239_s1 + $0x2a0] ss:$8 sps:$4 sm:$0xff]  }
  0x30   :  { %676 = vmatprep.subr.bf16.mxu0 %v1551_v50  ;;  %718 = vmatpush2.bf16.msra.mxu1 %v1550_v51  ;;  %v1617_v50 = vld [vmem:[%s2239_s1 + $0x290] ss:$8 sps:$4 sm:$0xff]   ;;  %v1625_v51 = vld [vmem:[%s2239_s1 + $0x284] ss:$8 sps:$4 sm:$0xff]  }
  0x31   :  { %719 = vmatprep.subr.bf16.mxu1 %v1554_v54  ;;  %v38_v54 = vld [vmem:[%s2240_s0 + $0x58] sm:$0xff] }
  0x32   :  { %v45_v55 = vpack.c.bf16 %v38_v54, %v31_v53 }
  0x33   :  { %677 = vmatpush2.bf16.msra.mxu0 %v1553_v56  ;;  %v1626_v56 = vld [vmem:[%s2241_s3 + $0x70] ss:$8 sps:$4 sm:$0xff]  }
  0x34   :  { %678 = vmatprep.subr.bf16.mxu0 %v1557_v57  ;;  %720 = vmatpush2.bf16.msra.mxu1 %v1556_v58  ;;  %v1628_v57 = vld [vmem:[%s2241_s3 + $0x74] ss:$8 sps:$4 sm:$0xff]   ;;  %v1631_v58 = vld [vmem:[%s2241_s3 + $0x64] ss:$8 sps:$4 sm:$0xff]  }
  0x35   :  { %721 = vmatprep.subr.bf16.mxu1 %v1560_v59  ;;  %v1629_v59 = vld [vmem:[%s2241_s3 + $0x60] ss:$8 sps:$4 sm:$0xff]  }
  0x37   :  { %679 = vmatpush2.bf16.msra.mxu0 %v1559_v60  ;;  %v1634_v60 = vld [vmem:[%s2241_s3 + $0x54] ss:$8 sps:$4 sm:$0xff]  }
  0x38   :  { %680 = vmatprep.subr.bf16.mxu0 %v1563_v61  ;;  %722 = vmatpush2.bf16.msra.mxu1 %v1562_v62  ;;  %v1632_v61 = vld [vmem:[%s2241_s3 + $0x50] ss:$8 sps:$4 sm:$0xff]   ;;  %v1637_v62 = vld [vmem:[%s2241_s3 + $0x44] ss:$8 sps:$4 sm:$0xff]  }
  0x39   :  { %723 = vmatprep.subr.bf16.mxu1 %v1566_v63  ;;  %v1635_v63 = vld [vmem:[%s2241_s3 + $0x40] ss:$8 sps:$4 sm:$0xff]  }
  0x3b   :  { %681 = vmatpush2.bf16.msra.mxu0 %v1565_v0  ;;  %v1640_v0 = vld [vmem:[%s2241_s3 + $0x34] ss:$8 sps:$4 sm:$0xff]  }
  0x3c   :  { %682 = vmatprep.subr.bf16.mxu0 %v1569_v2  ;;  %724 = vmatpush2.bf16.msra.mxu1 %v1568_v1  ;;  %v1638_v1 = vld [vmem:[%s2241_s3 + $0x30] ss:$8 sps:$4 sm:$0xff]   ;;  %v1643_v2 = vld [vmem:[%s2241_s3 + $0x24] ss:$8 sps:$4 sm:$0xff]  }
  0x3d   :  { %725 = vmatprep.subr.bf16.mxu1 %v1572_v4  ;;  %v1646_v4 = vld [vmem:[%s2241_s3 + $0x14] ss:$8 sps:$4 sm:$0xff]  }
  0x3f   :  { %683 = vmatpush2.bf16.msra.mxu0 %v1571_v3  ;;  %v1641_v3 = vld [vmem:[%s2241_s3 + $0x20] ss:$8 sps:$4 sm:$0xff]  }
  0x40   :  { %738 = vmatprep.subr.bf16.mxu0 %v1577_v8  ;;  %726 = vmatpush2.bf16.msra.mxu1 %v1574_v6  ;;  %v1649_v6 = vld [vmem:[%s2241_s3 + $0x4] ss:$8 sps:$4 sm:$0xff]   ;;  %v1652_v8 = vld [vmem:[%s2241_s3 + $0xf4] ss:$8 sps:$4 sm:$0xff]  }
  0x41   :  { %795 = vmatprep.subr.bf16.mxu1 %v1622_v16  ;;  %v1664_v16 = vld [vmem:[%s2241_s3 + $0xb4] ss:$8 sps:$4 sm:$0xff]  }
  0x42   :  { %685 = vmatmul.mubr.bf16.vlgmr.msra.gmra.mxu0 %v41_v11  ;;  %v1653_v11 = vld [vmem:[%s2241_s3 + $0xe0] ss:$8 sps:$4 sm:$0xff]  }
  0x43   :  { %739 = vmatpush1.bf16.msra.mxu0 %v1575_v12  ;;  %728 = vmatmul.mubr.bf16.vlgmr.msra.gmra.mxu1 %v43_v13  ;;  %v1658_v12 = vld [vmem:[%s2241_s3 + $0xd4] ss:$8 sps:$4 sm:$0xff]   ;;  %v1656_v13 = vld [vmem:[%s2241_s3 + $0xd0] ss:$8 sps:$4 sm:$0xff]  }
  0x44   :  { %740 = vmatprep.subr.bf16.mxu0 %v1580_v14  ;;  %813 = vmatprep.mubr.bf16.mxu1 %v1698_v20  ;;  %v1661_v14 = vld [vmem:[%s2241_s3 + $0xc4] ss:$8 sps:$4 sm:$0xff]   ;;  %v1670_v20 = vld [vmem:[%s2241_s3 + $0x94] ss:$8 sps:$4 sm:$0xff]  }
  0x45   :  { %796 = vmatpush1.bf16.msra.mxu1 %v1620_v15  ;;  %770 = vmatprep.mubr.bf16.mxu0 %v46_v24  ;;  %v1659_v15 = vld [vmem:[%s2241_s3 + $0xc0] ss:$8 sps:$4 sm:$0xff]   ;;  %v1674_v24 = vld [vmem:[%s2242_s5 + $0x78] sm:$0xff]  }
  0x46   :  { %1038 = vmatprep.subr.bf16.mxu1 %v1628_v57 }
  0x47   :  { %741 = vmatpush1.bf16.msra.mxu0 %v1578_v17  ;;  %v1662_v17 = vld [vmem:[%s2241_s3 + $0xb0] ss:$8 sps:$4 sm:$0xff]  }
  0x48   :  { %742 = vmatprep.subr.bf16.mxu0 %v1583_v18  ;;  %v1667_v18 = vld [vmem:[%s2241_s3 + $0xa4] ss:$8 sps:$4 sm:$0xff]  }
  0x4b   :  { %743 = vmatpush1.bf16.msra.mxu0 %v1581_v25  ;;  %1397 = vmatmul.mubr.msk.bf16.vlgmr.msra.gmra.mxu1 %vm648_vm0, %v47_v27  ;;  %v1675_v25 = vld [vmem:[%s2242_s5 + $0x38] sm:$0xff]   ;;  %v1677_v27 = vld [vmem:[%s2242_s5 + $0x30] sm:$0xff]  }
  0x4c   :  { %744 = vmatprep.subr.bf16.mxu0 %v1586_v26  ;;  %1039 = vmatpush1.bf16.msra.mxu1 %v1626_v56  ;;  %v1676_v26 = vld [vmem:[%s2242_s5 + $0x70] sm:$0xff]  }
  0x4d   :  { %1040 = vmatprep.subr.bf16.mxu1 %v1631_v58 }
  0x4f   :  { %745 = vmatpush1.bf16.msra.mxu0 %v1584_v28  ;;  %v1678_v28 = vld [vmem:[%s2242_s5 + $0x68] sm:$0xff]  }
  0x50   :  { %746 = vmatprep.subr.bf16.mxu0 %v1589_v29  ;;  %1041 = vmatpush1.bf16.msra.mxu1 %v1629_v59  ;;  %v1679_v29 = vld [vmem:[%s2242_s5 + $0x28] sm:$0xff]  }
  0x51   :  { %1042 = vmatprep.subr.bf16.mxu1 %v1634_v60 }
  0x53   :  { %747 = vmatpush1.bf16.msra.mxu0 %v1587_v30  ;;  %v1680_v30 = vld [vmem:[%s2242_s5 + $0x60] sm:$0xff]  }
  0x54   :  { %748 = vmatprep.subr.bf16.mxu0 %v1592_v31  ;;  %1043 = vmatpush1.bf16.msra.mxu1 %v1632_v61  ;;  %v1681_v31 = vld [vmem:[%s2242_s5 + $0x20] sm:$0xff]  }
  0x55   :  { %1044 = vmatprep.subr.bf16.mxu1 %v1637_v62 }
  0x57   :  { %749 = vmatpush1.bf16.msra.mxu0 %v1590_v32  ;;  %v148_v32 = vlaneseq }
  0x58   :  { %750 = vmatprep.subr.bf16.mxu0 %v1595_v33  ;;  %1045 = vmatpush1.bf16.msra.mxu1 %v1635_v63 }
  0x59   :  { %1046 = vmatprep.subr.bf16.mxu1 %v1640_v0 }
  0x5b   :  { %751 = vmatpush1.bf16.msra.mxu0 %v1593_v34  ;;  %v2195_v34 = vshrl.u32 %v148_v32, 7 }
  0x5c   :  { %752 = vmatprep.subr.bf16.mxu0 %v1598_v35  ;;  %1047 = vmatpush1.bf16.msra.mxu1 %v1638_v1 }
  0x5d   :  { %1048 = vmatprep.subr.bf16.mxu1 %v1643_v2 }
  0x5f   :  { %753 = vmatpush1.bf16.msra.mxu0 %v1596_v36 }
  0x60   :  { %754 = vmatprep.subr.bf16.mxu0 %v1601_v37  ;;  %1049 = vmatpush1.bf16.msra.mxu1 %v1641_v3  ;;  %v150_v37 = vsub.s32 0, %v2195_v34 }
  0x61   :  { %1050 = vmatprep.subr.bf16.mxu1 %v1646_v4 }
  0x63   :  { %755 = vmatpush2.bf16.msra.mxu0 %v1599_v38  ;;  %v146_v38 = vld [vmem:[%s2243_s2] sm:$0x3] }
  0x64   :  { %756 = vmatprep.subr.bf16.mxu0 %v1604_v39  ;;  %1051 = vmatpush1.bf16.msra.mxu1 %v1644_v5  ;;  %v154_v39 = vsub.s32 1, %v2195_v34 }
  0x65   :  { %1052 = vmatprep.subr.bf16.mxu1 %v1649_v6 }
  0x67   :  { %757 = vmatpush2.bf16.msra.mxu0 %v1602_v40 }
  0x68   :  { %758 = vmatprep.subr.bf16.mxu0 %v1607_v41  ;;  %1053 = vmatpush1.bf16.msra.mxu1 %v1647_v7 }
  0x69   :  { %1054 = vmatprep.subr.bf16.mxu1 %v1652_v8 }
  0x6b   :  { %759 = vmatpush2.bf16.msra.mxu0 %v1605_v42  ;;  %v151_v42 = vrot.slane %v146_v38, %v150_v37 }
  0x6c   :  { %760 = vmatprep.subr.bf16.mxu0 %v1610_v43  ;;  %1055 = vmatpush2.bf16.msra.mxu1 %v1650_v9  ;;  %v155_v43 = vrot.slane %v146_v38, %v154_v39 }
  0x6d   :  { %1056 = vmatprep.subr.bf16.mxu1 %v1655_v10 }
  0x6f   :  { %761 = vmatpush2.bf16.msra.mxu0 %v1608_v44 }
  0x70   :  { %762 = vmatprep.subr.bf16.mxu0 %v1613_v45  ;;  %1057 = vmatpush2.bf16.msra.mxu1 %v1653_v11 }
  0x71   :  { %1058 = vmatprep.subr.bf16.mxu1 %v1658_v12 }
  0x73   :  { %763 = vmatpush2.bf16.msra.mxu0 %v1611_v46 }
  0x74   :  { %764 = vmatprep.subr.bf16.mxu0 %v1616_v47  ;;  %1059 = vmatpush2.bf16.msra.mxu1 %v1656_v13 }
  0x75   :  { %1060 = vmatprep.subr.bf16.mxu1 %v1661_v14 }
  0x77   :  { %765 = vmatpush2.bf16.msra.mxu0 %v1614_v48 }
  0x78   :  { %766 = vmatprep.subr.bf16.mxu0 %v1619_v49  ;;  %1061 = vmatpush2.bf16.msra.mxu1 %v1659_v15 }
  0x79   :  { %1062 = vmatprep.subr.bf16.mxu1 %v1664_v16 }
  0x7b   :  { %767 = vmatpush2.bf16.msra.mxu0 %v1617_v50 }
  0x7c   :  { %768 = vmatprep.subr.bf16.mxu0 %v1625_v51  ;;  %1063 = vmatpush2.bf16.msra.mxu1 %v1662_v17  ;;  %v1682_v17 = vld [vmem:[%s2242_s5 + $0x58] sm:$0xff]  }
  0x7d   :  { %1064 = vmatprep.subr.bf16.mxu1 %v1667_v18  ;;  %v1683_v18 = vld [vmem:[%s2242_s5 + $0x18] sm:$0xff]  }
  0x7f   :  { %769 = vmatpush2.bf16.msra.mxu0 %v1623_v52 }
  0x80   :  { %1065 = vmatpush2.bf16.msra.mxu1 %v1665_v19  ;;  %1456 = vmatprep.subr.bf16.mxu0 %v1674_v24  ;;  %v1684_v19 = vld [vmem:[%s2242_s5 + $0x50] sm:$0xff]   ;;  %v1689_v24 = vld [vmem:[%s2242_s5] sm:$0xff]  }
  0x81   :  { %1066 = vmatprep.subr.bf16.mxu1 %v1670_v20  ;;  %v1685_v20 = vld [vmem:[%s2242_s5 + $0x10] sm:$0xff]  }
  0x82   :  { %771 = vmatmul.mubr.bf16.vlgmr.msra.gmra.mxu0 %v45_v55 }
  0x83   :  { %1457 = vmatpush3.bf16.msra.mxu0 %v1675_v25  ;;  %v866_v25 = vld [vmem:[%s2244_s4] sm:$0x3] }
  0x84   :  { %1067 = vmatpush2.bf16.msra.mxu1 %v1668_v21  ;;  %1458 = vmatprep.subr.bf16.mxu0 %v1676_v26  ;;  %v1686_v21 = vld [vmem:[%s2242_s5 + $0x48] sm:$0xff]   ;;  %v875_v26 = vrot.slane %v866_v25, %v154_v39 }
  0x85   :  { %1068 = vmatprep.subr.bf16.mxu1 %v1673_v22  ;;  %v1687_v22 = vld [vmem:[%s2242_s5 + $0x8] sm:$0xff]  }
  0x87   :  { %1459 = vmatpush3.bf16.msra.mxu0 %v1677_v27  ;;  %v871_v27 = vrot.slane %v866_v25, %v150_v37 }
  0x88   :  { %1069 = vmatpush2.bf16.msra.mxu1 %v1671_v23  ;;  %1460 = vmatprep.subr.bf16.mxu0 %v1678_v28  ;;  %v1688_v23 = vld [vmem:[%s2242_s5 + $0x40] sm:$0xff]  }
  0x8b   :  { %1461 = vmatpush3.bf16.msra.mxu0 %v1679_v29 }
  0x8c   :  { %1462 = vmatprep.subr.bf16.mxu0 %v1680_v30 }
  0x8f   :  { %1463 = vmatpush3.bf16.msra.mxu0 %v1681_v31 }
  0x90   :  { %1464 = vmatprep.subr.bf16.mxu0 %v1682_v17 }
  0x93   :  { %1465 = vmatpush3.bf16.msra.mxu0 %v1683_v18 }
  0x94   :  { %1466 = vmatprep.subr.bf16.mxu0 %v1684_v19 }
  0x97   :  { %1467 = vmatpush3.bf16.msra.mxu0 %v1685_v20 }
  0x98   :  { %1468 = vmatprep.subr.bf16.mxu0 %v1686_v21 }
  0x9b   :  { %1469 = vmatpush3.bf16.msra.mxu0 %v1687_v22 }
  0x9c   :  { %1470 = vmatprep.subr.bf16.mxu0 %v1688_v23 }
  0x9f   :  { %1471 = vmatpush3.bf16.msra.mxu0 %v1689_v24 }
 0x102   :  { %v686_v35 = vpop.f32.mrf.mxu0 }
 0x103   :  { %v729_v33 = vpop.f32.mrf.mxu1  ;;  %v687_v46 = vadd.f32 %v686_v35, %v151_v42 }
 0x104   :  { %v688_v40 = vpop.f32.mrf.mxu0 }
 0x105   :  { %v731_v36 = vpop.f32.mrf.mxu1  ;;  %v689_v48 = vadd.f32 %v688_v40, %v155_v43  ;;  %v730_v51 = vadd.f32 %v729_v33, %v687_v46 }
 0x106   :  { %v690_v44 = vpop.f32.mrf.mxu0 }
 0x107   :  { %v733_v41 = vpop.f32.mrf.mxu1  ;;  %v691_v50 = vadd.f32 %v690_v44, %v151_v42  ;;  %v732_v54 = vadd.f32 %v731_v36, %v689_v48  ;;  %v1430_v48 = vld [vmem:[%s2245_s6] ss:$0 sm:$0xff] }
 0x108   :  { %v692_v49 = vpop.f32.mrf.mxu0 }
 0x109   :  { %v735_v45 = vpop.f32.mrf.mxu1  ;;  %v693_v55 = vadd.f32 %v692_v49, %v155_v43  ;;  %v734_v58 = vadd.f32 %v733_v41, %v691_v50 }
 0x10b   :  { %v815_v47 = vpop.f32.mrf.mxu1  ;;  %v736_v62 = vadd.f32 %v735_v45, %v693_v55 }
 0x10d   :  { %v817_v52 = vpop.f32.mrf.mxu1 }
 0x10f   :  { %v819_v60 = vpop.f32.mrf.mxu1 }
 0x111   :  { %v821_v5 = vpop.f32.mrf.mxu1 }
 0x142   :  { %v772_v53 = vpop.f32.mrf.mxu0 }
 0x143   :  { %v773_v56 = vadd.f32 %v772_v53, %v730_v51 }
 0x144   :  { %v774_v57 = vpop.f32.mrf.mxu0 }
 0x145   :  { %v775_v59 = vadd.f32 %v774_v57, %v732_v54  ;;  %v816_v1 = vadd.f32 %v815_v47, %v773_v56 }
 0x146   :  { %v776_v61 = vpop.f32.mrf.mxu0 }
 0x147   :  { %v818_v63 = vadd.f32 %v817_v52, %v775_v59  ;;  %v777_v0 = vadd.f32 %v776_v61, %v734_v58  ;;  %v824_v9 = vmul.f32 0.2, %v816_v1 }
 0x148   :  { %v778_v2 = vpop.f32.mrf.mxu0 }
 0x149   :  { %v820_v3 = vadd.f32 %v819_v60, %v777_v0  ;;  %v779_v4 = vadd.f32 %v778_v2, %v736_v62  ;;  %v825_v6 = vmul.f32 0.2, %v818_v63  ;;  %v828_v14 = vmax.f32 %v816_v1, %v824_v9 }
 0x14b   :  { %v826_v7 = vmul.f32 0.2, %v820_v3  ;;  %v822_v8 = vadd.f32 %v821_v5, %v779_v4  ;;  %v829_v12 = vmax.f32 %v818_v63, %v825_v6 }
 0x14d   :  { %v827_v10 = vmul.f32 0.2, %v822_v8  ;;  %v830_v11 = vmax.f32 %v820_v3, %v826_v7 }
 0x14f   :  { %v831_v13 = vmax.f32 %v822_v8, %v827_v10  ;;  %v832_v16 = vpack.c.bf16 %v830_v11, %v828_v14 }
 0x151   :  { %v833_v15 = vpack.c.bf16 %v831_v13, %v829_v12 }
 0x153   :  { %1070 = vmatprep.mubr.bf16.mxu1 %v833_v15 }
 0x154   :  { %1071 = vmatmul.mubr.bf16.vlgmr.msra.gmra.mxu1 %v832_v16 }
 0x214   :  { %v1072_v28 = vpop.f32.mrf.mxu1 }
 0x215   :  { %v1073_v31 = vadd.f32 %v1072_v28, %v871_v27 }
 0x216   :  { %v1074_v29 = vpop.f32.mrf.mxu1 }
 0x217   :  { %v1075_v30 = vadd.f32 %v1074_v29, %v875_v26  ;;  %v1081_v41 = vmul.f32 0.2, %v1073_v31 }
 0x218   :  { %v1076_v32 = vpop.f32.mrf.mxu1 }
 0x219   :  { %v1077_v33 = vadd.f32 %v1076_v32, %v871_v27  ;;  %v1082_v36 = vmul.f32 0.2, %v1075_v30  ;;  %v1085_v46 = vmax.f32 %v1073_v31, %v1081_v41 }
 0x21a   :  { %v1078_v35 = vpop.f32.mrf.mxu1 }
 0x21b   :  { %v1083_v38 = vmul.f32 0.2, %v1077_v33  ;;  %v1079_v40 = vadd.f32 %v1078_v35, %v875_v26  ;;  %v1086_v44 = vmax.f32 %v1075_v30, %v1082_v36 }
 0x21d   :  { %v1084_v42 = vmul.f32 0.2, %v1079_v40  ;;  %v1087_v43 = vmax.f32 %v1077_v33, %v1083_v38 }
 0x21f   :  { %v1088_v45 = vmax.f32 %v1079_v40, %v1084_v42  ;;  %v1089_v47 = vpack.c.bf16 %v1087_v43, %v1085_v46 }
 0x221   :  { %v1090_v39 = vpack.c.bf16 %v1088_v45, %v1086_v44 }
 0x223   :  { %1258 = vmatprep.mubr.bf16.mxu0 %v1090_v39 }
 0x224   :  { %1259 = vmatmul.mubr.bf16.vlgmr.msra.gmra.mxu0 %v1089_v47 }
 0x2e4   :  { %v1472_v34 = vpop.f32.mrf.mxu0 }
 0x2e6   :  { %v1473_v37 = vpop.f32.mrf.mxu0 }
 0x2e7   :  { %v1474_v49 = vadd.f32 %v1473_v37, %v1472_v34 }
 0x2e8   :  { %v1475_v50 = vpop.f32.mrf.mxu0 }
 0x2e9   :  { %v1261_v51 = vadd.f32 %v1474_v49, %v1430_v48 }
 0x2ea   :  { %v1476_v52 = vpop.f32.mrf.mxu0 }
 0x2eb   :  { %v1477_v53 = vadd.f32 %v1476_v52, %v1475_v50  ;;  %1267 = vmax.xlane.f32.xlu0 %v1261_v51 }
 0x2ed   :  { %v1264_v54 = vadd.f32 %v1477_v53, %v1430_v48 }
 0x2ef   :  { %1269 = vmax.xlane.f32.xlu0 %v1264_v54 }
 0x374   :  { %v1268_v55 = vpop.xlane.xlu0 %1267 }
 0x375   :  { %v1271_v56 = vsub.f32 %v1261_v51, %v1268_v55 }
 0x377   :  { %v1273_v57 = vmul.f32 1.442695, %v1271_v56 }
 0x378   :  { %v1270_v58 = vpop.xlane.xlu0 %1269 }
 0x379   :  { %1690 = vpow2.f32 %v1273_v57  ;;  %v1272_v59 = vsub.f32 %v1264_v54, %v1270_v58 }
 0x37b   :  { %v1275_v60 = vmul.f32 1.442695, %v1272_v59 }
 0x37d   :  { %1692 = vpow2.f32 %v1275_v60 }
 0x386   :  { %v1691_v61 = vpop.eup %1690 }
 0x387   :  { %1277 = vadd.xlane.f32.xlu1 %v1691_v61 }
 0x38a   :  { %v1693_v62 = vpop.eup %1692 }
 0x38b   :  { %1279 = vadd.xlane.f32.xlu1 %v1693_v62 }
 0x410   :  { %v1278_v63 = vpop.xlane.xlu1 %1277 }
 0x411   :  { %1694 = vrcp.f32 %v1278_v63 }
 0x414   :  { %v1280_v0 = vpop.xlane.xlu1 %1279 }
 0x415   :  { %1696 = vrcp.f32 %v1280_v0 }
 0x41e   :  { %v1695_v1 = vpop.eup %1694 }
 0x41f   :  { %v1283_v3 = vmul.f32 %v1695_v1, %v1691_v61 }
 0x422   :  { %v1697_v2 = vpop.eup %1696 }
 0x423   :  { %v1284_v4 = vmul.f32 %v1697_v2, %v1693_v62 }
 0x425   :  { %v1454_v5 = vpack.c.bf16 %v1284_v4, %v1283_v3 }
 0x427   :  { %1455 = vst [vmem:[%s2246_s7] sm:$0xff] %v1454_v5  }

</bundles_post_ra>
